<compile_context>
chip_gen: v5e
topology: v5e:2x2
jax: 0.10.0
libtpu: 0.0.40
codegen_flags: <defaults>
</compile_context>

<pallas_src>
import functools

import jax
import jax.numpy as jnp
from jax.experimental import pallas as pl
from jax.experimental.pallas import tpu as pltpu


def _round_up(x: int, m: int) -> int:
    return (x + m - 1) // m * m


@functools.lru_cache(maxsize=1)
def _device_kind() -> str:
    try:
        return jax.devices()[0].device_kind.lower()
    except Exception:  # pragma: no cover - e.g. no devices during tracing tools
        return ""


def _default_block_b() -> int:
    # v5e's default scoped VMEM is 16 MiB -> use a slightly smaller batch tile there.
    return 2048 if "v5" in _device_kind() else 4096


def _default_dimension_semantics(num_steps):
    # Only CORE_PARALLEL reliably shards a grid axis across v7x's two TensorCores;
    # keep plain "parallel" on single-TC chips (v5e/v6e), 1-step grids, or older jax.
    core_parallel = getattr(pltpu, "CORE_PARALLEL", None)
    if core_parallel is not None and "v7" in _device_kind() and num_steps >= 2:
        return (core_parallel,)
    return ("parallel",)


def qnetwork_kernel(x_ref, w1_ref, b1_ref, w2_ref, b2_ref, w3_ref, b3_ref, o_ref):
    # Per grid step:
    #   x:  [TB, Din]  (user ++ content, pre-concatenated, compute dtype)
    #   w1: [Din, H], w2: [H, H], w3: [1, H]   (compute dtype)
    #   b1, b2: [1, H] (f32)                   b3: [1, 1] scalar in SMEM (f32)
    #   out: [TB, 1] (f32)

    # Layer 1 -- a single MXU matmul (concat was fused in the wrapper).
    h1 = (jnp.dot(x_ref[...], w1_ref[...], preferred_element_type=jnp.float32)
          + b1_ref[...])
    h1 = jnp.maximum(h1, 0.0)

    # Layer 2
    h2 = (jnp.dot(h1.astype(w2_ref.dtype), w2_ref[...],
                  preferred_element_type=jnp.float32) + b2_ref[...])
    h2 = jnp.maximum(h2, 0.0)

    # Layer 3 (H -> 1): an N=1 MXU matmul would waste 127/128 of the array; use the
    # VPU (elementwise mul) + XLU (row reduce), which are otherwise idle here.
    w3_row = w3_ref[...].astype(jnp.float32)                      # [1, H]
    q = jnp.sum(h2 * w3_row, axis=-1, keepdims=True) + b3_ref[0, 0]
    # NOTE: (TB, 1) output -> masked 1-lane stores; a lane-dense [1, TB] layout would
    # need a [TB,1]->[1,TB] relayout whose cost outweighs the 4 B/row output traffic.
    o_ref[...] = q.astype(o_ref.dtype)


def prepare_params(params, compute_dtype=jnp.bfloat16):
    """One-time preprocessing of QNetwork params (cache the result across calls).

    params: (w1 [Din,H], b1 [H]/[1,H], w2 [H,H], b2, w3 [H,1]/[1,H]/[H], b3)
    Returns matmul operands cast to compute_dtype (bf16 halves weight HBM traffic)
    and biases as f32; b3 becomes a (1,1) scalar destined for SMEM.
    """
    w1, b1, w2, b2, w3, b3 = params
    hidden_dim = w1.shape[1]
    return (
        jnp.asarray(w1, compute_dtype),                          # [Din, H]
        jnp.asarray(b1, jnp.float32).reshape(1, hidden_dim),     # [1, H]
        jnp.asarray(w2, compute_dtype),                          # [H, H]
        jnp.asarray(b2, jnp.float32).reshape(1, hidden_dim),     # [1, H]
        jnp.asarray(w3, compute_dtype).reshape(1, hidden_dim),   # [1, H]
        jnp.asarray(b3, jnp.float32).reshape(1, 1),              # SMEM scalar
    )


def qnetwork_forward(user, content, prepared_params, *,
                     block_b=None,
                     vmem_limit_bytes=None,
                     dimension_semantics=None,
                     interpret=False):
    """user: [B, user_dim], content: [B, content_dim] -> Q-values [B, 1] (float32).

    prepared_params: output of prepare_params() (its dtype sets the MXU operand
        dtype; accumulation / biases / ReLU / final reduce are always f32).
    block_b: batch rows per grid step.  Default 2048 (v5e) / 4096 (v6e/v7x); if you
        push past ~4096 on v5e also raise vmem_limit_bytes (default scoped VMEM is
        16 MiB there; 32 MiB on v6e/v7x, 64 MiB physical on v7x).
    """
    if user.shape[0] != content.shape[0]:
        raise ValueError(
            f"Batch size mismatch: user.shape={user.shape}, content.shape={content.shape}")

    w1, b1f, w2c, b2f, w3_row, b3s = prepared_params
    compute_dtype = w1.dtype
    in_dim = w1.shape[0]
    user_dim, content_dim = user.shape[1], content.shape[1]
    if user_dim + content_dim != in_dim:
        raise ValueError(
            f"Input dim mismatch: user_dim={user_dim}, content_dim={content_dim}, "
            f"expected user_dim+content_dim={in_dim}")

    B = user.shape[0]
    if block_b is None:
        block_b = _default_block_b()

    # Fused layer-1 concat: one [B, Din] operand -> a single K=Din MXU matmul in the
    # kernel instead of two K=16 matmuls.  The concat rides the same pass as the
    # compute-dtype cast (no extra full HBM round trip vs. two separate casts).
    x = jnp.concatenate(
        [user.astype(compute_dtype), content.astype(compute_dtype)], axis=1)

    if B <= block_b:
        TB = B                        # single full-extent block, no edge masking
    else:
        TB = _round_up(block_b, 16)   # sublane-aligned for f32 (8) and packed bf16 (16)
    num_steps = pl.cdiv(B, TB)        # no wrapper pad; last partial block is masked

    if dimension_semantics is None:
        dimension_semantics = _default_dimension_semantics(num_steps)

    # Constant index_map -> weights are not re-DMA'd across grid steps.
    const2d = lambda shape: pl.BlockSpec(shape, lambda i: (0, 0))

    out = pl.pallas_call(
        qnetwork_kernel,
        out_shape=jax.ShapeDtypeStruct((B, 1), jnp.float32),
        grid=(num_steps,),
        in_specs=[
            pl.BlockSpec((TB, in_dim), lambda i: (i, 0)),
            const2d(w1.shape),
            const2d(b1f.shape),
            const2d(w2c.shape),
            const2d(b2f.shape),
            const2d(w3_row.shape),
            pl.BlockSpec(memory_space=pltpu.MemorySpace.SMEM),   # b3 scalar
        ],
        out_specs=pl.BlockSpec((TB, 1), lambda i: (i, 0)),
        compiler_params=pltpu.CompilerParams(
            dimension_semantics=dimension_semantics,
            vmem_limit_bytes=vmem_limit_bytes,
        ),
        interpret=interpret,
    )(x, w1, b1f, w2c, b2f, w3_row, b3s)

    return out


def init_params(key, user_dim, content_dim, hidden_dim=128):
    """Deterministic init mimicking nn.Linear (uniform +/- 1/sqrt(fan_in)); f32 master."""
    in_dim = user_dim + content_dim
    keys = jax.random.split(key, 6)

    def linear(kw, kb, fan_in, fan_out):
        bound = 1.0 / jnp.sqrt(jnp.float32(fan_in))
        w = jax.random.uniform(kw, (fan_in, fan_out), jnp.float32, -bound, bound)
        b = jax.random.uniform(kb, (1, fan_out), jnp.float32, -bound, bound)
        return w, b

    w1, b1 = linear(keys[0], keys[1], in_dim, hidden_dim)
    w2, b2 = linear(keys[2], keys[3], hidden_dim, hidden_dim)
    w3, b3 = linear(keys[4], keys[5], hidden_dim, 1)
    return (w1, b1, w2, b2, w3, b3)


if __name__ == "__main__":
    # Small shapes; hidden_dim=128 (module default) keeps H lane-aligned.
    batch, user_dim, content_dim, hidden_dim = 8, 16, 16, 128

    key = jax.random.PRNGKey(0)
    k_user, k_content, k_params = jax.random.split(key, 3)
    user = jax.random.normal(k_user, (batch, user_dim), jnp.float32)
    content = jax.random.normal(k_content, (batch, content_dim), jnp.float32)
    params = init_params(k_params, user_dim, content_dim, hidden_dim)

    # Plain-JAX reference (matches the PyTorch module's forward).
    w1, b1, w2, b2, w3, b3 = params

    def ref_fwd(u, c):
        xx = jnp.concatenate([u, c], axis=1)
        h1 = jnp.maximum(xx @ w1 + b1, 0.0)
        h2 = jnp.maximum(h1 @ w2 + b2, 0.0)
        return h2 @ w3 + b3

    ref = ref_fwd(user, content)

    # Prepared params are cached once and reused across calls (perf-review item).
    prep_f32 = prepare_params(params, jnp.float32)    # test-only path
    prep_bf16 = prepare_params(params, jnp.bfloat16)  # production path

    # f32 operands: tight check.
    q_f32 = jax.block_until_ready(qnetwork_forward(user, content, prep_f32))
    assert q_f32.shape == (batch, 1)
    assert jnp.allclose(q_f32, ref, atol=1e-5, rtol=1e-5)

    # bf16 operands / f32 accumulation: looser tolerance.
    q_bf16 = jax.block_until_ready(qnetwork_forward(user, content, prep_bf16))
    assert q_bf16.shape == (batch, 1)
    assert jnp.allclose(q_bf16, ref, atol=5e-2, rtol=5e-2)

    # Ragged batch (single full-extent block, B not a multiple of 8).
    q_odd = jax.block_until_ready(qnetwork_forward(user[:5], content[:5], prep_f32))
    assert q_odd.shape == (5, 1)
    assert jnp.allclose(q_odd, ref[:5], atol=1e-5, rtol=1e-5)

    # Multi-step grid with a partial (masked) last block: B=63, TB=16 -> 4 steps.
    big_B = 63
    ub = jax.random.normal(jax.random.PRNGKey(1), (big_B, user_dim), jnp.float32)
    cb = jax.random.normal(jax.random.PRNGKey(2), (big_B, content_dim), jnp.float32)
    q_big = jax.block_until_ready(qnetwork_forward(ub, cb, prep_f32, block_b=16))
    assert q_big.shape == (big_B, 1)
    assert jnp.allclose(q_big, ref_fwd(ub, cb), atol=1e-5, rtol=1e-5)

    print("KERNEL_OK")
</pallas_src>

<mosaic_0001>
module attributes {stable_mosaic.version = 11 : i64} {
  func.func @qnetwork_kernel(%arg0: i32, %arg1: memref<8x32xf32, #tpu.memory_space<vmem>>, %arg2: memref<32x128xf32, #tpu.memory_space<vmem>>, %arg3: memref<1x128xf32, #tpu.memory_space<vmem>>, %arg4: memref<128x128xf32, #tpu.memory_space<vmem>>, %arg5: memref<1x128xf32, #tpu.memory_space<vmem>>, %arg6: memref<1x128xf32, #tpu.memory_space<vmem>>, %arg7: memref<1x1xf32, #tpu.memory_space<smem>>, %arg8: memref<8x1xf32, #tpu.memory_space<vmem>>) attributes {dimension_semantics = [#tpu.dimension_semantics<parallel>], iteration_bounds = array<i64: 1>, scalar_prefetch = 0 : i64, scratch_operands = 0 : i64, tpu.core_type = #tpu.core_type<tc>, window_params = [{transform_indices = @transform_0, window_bounds = array<i64: 8, 32>}, {pipeline_mode = #tpu.pipeline_mode<synchronous>, transform_indices = @transform_1, window_bounds = array<i64: 32, 128>}, {pipeline_mode = #tpu.pipeline_mode<synchronous>, transform_indices = @transform_2, window_bounds = array<i64: 1, 128>}, {pipeline_mode = #tpu.pipeline_mode<synchronous>, transform_indices = @transform_3, window_bounds = array<i64: 128, 128>}, {pipeline_mode = #tpu.pipeline_mode<synchronous>, transform_indices = @transform_4, window_bounds = array<i64: 1, 128>}, {pipeline_mode = #tpu.pipeline_mode<synchronous>, transform_indices = @transform_5, window_bounds = array<i64: 1, 128>}, {transform_indices = @transform_6, window_bounds = array<i64: 1, 1>}, {transform_indices = @transform_7, window_bounds = array<i64: 8, 1>}]} {
    %c0 = arith.constant 0 : index
    %c0_0 = arith.constant 0 : index
    %0 = vector.load %arg1[%c0, %c0_0] : memref<8x32xf32, #tpu.memory_space<vmem>>, vector<8x32xf32>
    %c0_1 = arith.constant 0 : index
    %c0_2 = arith.constant 0 : index
    %1 = vector.load %arg2[%c0_1, %c0_2] : memref<32x128xf32, #tpu.memory_space<vmem>>, vector<32x128xf32>
    %cst = arith.constant dense<0.000000e+00> : vector<8x128xf32>
    %2 = tpu.matmul %0, %1, %cst {dimension_numbers = #tpu.dot_dimension_numbers<[1], [0], [0], [1], [0, 0, 1, 1], [], []>} : vector<8x32xf32>, vector<32x128xf32>, vector<8x128xf32> -> vector<8x128xf32>
    %c0_3 = arith.constant 0 : index
    %c0_4 = arith.constant 0 : index
    %3 = vector.load %arg3[%c0_3, %c0_4] : memref<1x128xf32, #tpu.memory_space<vmem>>, vector<1x128xf32>
    %4 = vector.broadcast %3 : vector<1x128xf32> to vector<8x128xf32>
    %5 = arith.addf %2, %4 : vector<8x128xf32>
    %cst_5 = arith.constant 0.000000e+00 : f32
    %6 = vector.broadcast %cst_5 : f32 to vector<8x128xf32>
    %7 = arith.maximumf %5, %6 : vector<8x128xf32>
    %c0_6 = arith.constant 0 : index
    %c0_7 = arith.constant 0 : index
    %8 = vector.load %arg4[%c0_6, %c0_7] : memref<128x128xf32, #tpu.memory_space<vmem>>, vector<128x128xf32>
    %cst_8 = arith.constant dense<0.000000e+00> : vector<8x128xf32>
    %9 = tpu.matmul %7, %8, %cst_8 {dimension_numbers = #tpu.dot_dimension_numbers<[1], [0], [0], [1], [0, 0, 1, 1], [], []>} : vector<8x128xf32>, vector<128x128xf32>, vector<8x128xf32> -> vector<8x128xf32>
    %c0_9 = arith.constant 0 : index
    %c0_10 = arith.constant 0 : index
    %10 = vector.load %arg5[%c0_9, %c0_10] : memref<1x128xf32, #tpu.memory_space<vmem>>, vector<1x128xf32>
    %11 = vector.broadcast %10 : vector<1x128xf32> to vector<8x128xf32>
    %12 = arith.addf %9, %11 : vector<8x128xf32>
    %cst_11 = arith.constant 0.000000e+00 : f32
    %13 = vector.broadcast %cst_11 : f32 to vector<8x128xf32>
    %14 = arith.maximumf %12, %13 : vector<8x128xf32>
    %c0_12 = arith.constant 0 : index
    %c0_13 = arith.constant 0 : index
    %15 = vector.load %arg6[%c0_12, %c0_13] : memref<1x128xf32, #tpu.memory_space<vmem>>, vector<1x128xf32>
    %16 = vector.broadcast %15 : vector<1x128xf32> to vector<8x128xf32>
    %17 = arith.mulf %14, %16 : vector<8x128xf32>
    %cst_14 = arith.constant dense<0.000000e+00> : vector<8xf32>
    %18 = vector.multi_reduction <add>, %17, %cst_14 [1] : vector<8x128xf32> to vector<8xf32>
    %19 = vector.shape_cast %18 : vector<8xf32> to vector<8x1xf32>
    %c0_15 = arith.constant 0 : index
    %c0_16 = arith.constant 0 : index
    %20 = memref.load %arg7[%c0_15, %c0_16] : memref<1x1xf32, #tpu.memory_space<smem>>
    %21 = vector.broadcast %20 : f32 to vector<8x1xf32>
    %22 = arith.addf %19, %21 : vector<8x1xf32>
    %c0_17 = arith.constant 0 : index
    %c0_18 = arith.constant 0 : index
    %23 = vector.load %arg8[%c0_17, %c0_18] : memref<8x1xf32, #tpu.memory_space<vmem>>, vector<8x1xf32>
    tpu.vector_store %arg8[%c0_17, %c0_18], %22 {strides = array<i32>} : memref<8x1xf32, #tpu.memory_space<vmem>>, vector<8x1xf32>,
    return
  }
  func.func @transform_0(%arg0: i32) -> (i32, i32) {
    %c0_i32 = arith.constant 0 : i32
    %c0_i32_0 = arith.constant 0 : i32
    return %arg0, %c0_i32 : i32, i32
  }
  func.func @transform_1(%arg0: i32) -> (i32, i32) {
    %c0_i32 = arith.constant 0 : i32
    %c0_i32_0 = arith.constant 0 : i32
    %c0_i32_1 = arith.constant 0 : i32
    return %c0_i32, %c0_i32_0 : i32, i32
  }
  func.func @transform_2(%arg0: i32) -> (i32, i32) {
    %c0_i32 = arith.constant 0 : i32
    %c0_i32_0 = arith.constant 0 : i32
    %c0_i32_1 = arith.constant 0 : i32
    return %c0_i32, %c0_i32_0 : i32, i32
  }
  func.func @transform_3(%arg0: i32) -> (i32, i32) {
    %c0_i32 = arith.constant 0 : i32
    %c0_i32_0 = arith.constant 0 : i32
    %c0_i32_1 = arith.constant 0 : i32
    return %c0_i32, %c0_i32_0 : i32, i32
  }
  func.func @transform_4(%arg0: i32) -> (i32, i32) {
    %c0_i32 = arith.constant 0 : i32
    %c0_i32_0 = arith.constant 0 : i32
    %c0_i32_1 = arith.constant 0 : i32
    return %c0_i32, %c0_i32_0 : i32, i32
  }
  func.func @transform_5(%arg0: i32) -> (i32, i32) {
    %c0_i32 = arith.constant 0 : i32
    %c0_i32_0 = arith.constant 0 : i32
    %c0_i32_1 = arith.constant 0 : i32
    return %c0_i32, %c0_i32_0 : i32, i32
  }
  func.func @transform_6(%arg0: i32) -> (i32, i32) {
    %c0_i32 = arith.constant 0 : i32
    %c0_i32_0 = arith.constant 0 : i32
    %c0_i32_1 = arith.constant 0 : i32
    return %c0_i32, %c0_i32_0 : i32, i32
  }
  func.func @transform_7(%arg0: i32) -> (i32, i32) {
    %c0_i32 = arith.constant 0 : i32
    %c0_i32_0 = arith.constant 0 : i32
    return %arg0, %c0_i32 : i32, i32
  }
}

</mosaic_0001>

<bundles_post_ra>
// kernel: tpu_custom_call.1
= control target key start
LH: loop header
LB: loop body
LE: loop exit
PB: predicated region body
PF: predicated region fallthrough
CT: control target
= control target key end

     0   :  { %13 = vsyncpa [#allocation4], 0  ;;  %s319_s0 = inlined_call_operand.hbm [shape: f32[8,32], index: 0, kind: input, shape index: {}]   ;;  %s320_s1 = inlined_call_operand.hbm [shape: f32[32,128], index: 1, kind: input, shape index: {}]   ;;  %s321_s2 = inlined_call_operand.vmem [shape: f32[1,128], index: 2, kind: input, shape index: {}]   ;;  %s322_s3 = inlined_call_operand.hbm [shape: f32[128,128], index: 3, kind: input, shape index: {}]   ;;  %s323_s4 = inlined_call_operand.vmem [shape: f32[1,128], index: 4, kind: input, shape index: {}]   ;;  %s324_s5 = inlined_call_operand.vmem [shape: f32[1,128], index: 5, kind: input, shape index: {}]   ;;  %s325_s6 = inlined_call_operand.<no memory space> [shape: f32[1,1], index: 6, kind: input, shape index: {}]   ;;  %s326_s7 = inlined_call_operand.vmem [shape: f32[8,1], index: 7, kind: output, shape index: {}]  }
   0x1   :  { %14 = vsyncpa [#allocation6], 0  ;;  %s30_s26 = sshll.u32 %s320_s1, 4  ;;  %s250_s27 = smov [#allocation5]   ;;  %s31_s26 = int_to_ptr.hbm [resolvable:$true] %s30_s26 }
   0x2   :  { %s32_s28 = sshll.u32 %s250_s27, 4  ;;  %s20_s8 = sshll.u32 %s319_s0, 4  ;;  %s33_s28 = int_to_ptr.vmem [resolvable:$true] %s32_s28  ;;  %s21_s8 = int_to_ptr.hbm [resolvable:$true] %s20_s8 }
   0x3   :  { %s251_s9 = smov 128   ;;  %s252_s10 = smov 8  }
   0x4   :  { %38 = dma.hbm_to_vmem [thread:$0]  %s31_s26, 512, %s33_s28, [#allocation6], %s251_s9, %s251_s9, %s252_s10  }
   0x5   :  { %s253_s11 = smov [#allocation3]   ;;  %s45_s15 = sshll.u32 %s322_s3, 4  ;;  %s46_s15 = int_to_ptr.hbm [resolvable:$true] %s45_s15 }
   0x6   :  { %s22_s12 = sshll.u32 %s253_s11, 4  ;;  %s254_s1 = smov [#allocation7]   ;;  %s23_s12 = int_to_ptr.vmem [resolvable:$true] %s22_s12 }
   0x7   :  { %25 = dma.hbm_to_vmem [thread:$0]  %s21_s8, 128, %s23_s12, [#allocation4]  }
   0x8   :  { %s47_s16 = sshll.u32 %s254_s1, 4  ;;  %s48_s16 = int_to_ptr.vmem [resolvable:$true] %s47_s16 }
   0x9   :  { %53 = dma.hbm_to_vmem [thread:$0]  %s46_s15, 2048, %s48_s16, [#allocation6], %s251_s9, %s251_s9, %s252_s10  }
   0xa   :  { %246 = dma.done.wait [#allocation4], 128  }
   0xb   :  { %247 = vsyncadd [#allocation4], 4294967168 }
   0xc   :  { %248 = dma.done.wait [#allocation6], 2560  }
   0xd   :  { %249 = vsyncadd [#allocation6], 4294964736  ;;  %v76_v0 = vld [vmem:[#allocation5 + $0x18] sm:$0xff]  ;;  %v75_v1 = vld [vmem:[#allocation5 + $0x10] sm:$0xff]  ;;  %vm81_vm0 = vcmask 261120   ;;  %v155_v31 = vstv %s325_s6  ;;  %vm157_vm1 = vcmask 7168  }
   0xe   :  { %97 = vmatpush.msra.mxu0 %v76_v0  ;;  %v121_v2 = vld [vmem:[#allocation7 + $0x78] sm:$0xff]  ;;  %v74_v3 = vld [vmem:[#allocation5 + $0x8] sm:$0xff]  ;;  %v120_v4 = vld [vmem:[#allocation7 + $0x70] sm:$0xff] }
   0xf   :  { %126 = vmatpush.msra.mxu1 %v121_v2  ;;  %v119_v5 = vld [vmem:[#allocation7 + $0x68] sm:$0xff]  ;;  %v73_v6 = vld [vmem:[#allocation5] sm:$0xff]  ;;  %v72_v7 = vld [vmem:[#allocation3] sm:$0xff] }
  0x10   :  { %98 = vmatpush.msra.mxu0 %v75_v1  ;;  %v118_v8 = vld [vmem:[#allocation7 + $0x60] sm:$0xff]  ;;  %v117_v9 = vld [vmem:[#allocation7 + $0x58] sm:$0xff]  ;;  %v116_v10 = vld [vmem:[#allocation7 + $0x50] sm:$0xff] }
  0x11   :  { %127 = vmatpush.msra.mxu1 %v120_v4  ;;  %v115_v11 = vld [vmem:[#allocation7 + $0x48] sm:$0xff]  ;;  %v114_v12 = vld [vmem:[#allocation7 + $0x40] sm:$0xff]  ;;  %v113_v13 = vld [vmem:[#allocation7 + $0x38] sm:$0xff] }
  0x12   :  { %99 = vmatpush.msra.mxu0 %v74_v3  ;;  %v112_v14 = vld [vmem:[#allocation7 + $0x30] sm:$0xff]  ;;  %v111_v15 = vld [vmem:[#allocation7 + $0x28] sm:$0xff]  ;;  %v110_v16 = vld [vmem:[#allocation7 + $0x20] sm:$0xff] }
  0x13   :  { %128 = vmatpush.msra.mxu1 %v119_v5  ;;  %v109_v17 = vld [vmem:[#allocation7 + $0x18] sm:$0xff]  ;;  %v108_v18 = vld [vmem:[#allocation7 + $0x10] sm:$0xff]  ;;  %v107_v19 = vld [vmem:[#allocation7 + $0x8] sm:$0xff] }
  0x14   :  { %100 = vmatpush.msra.mxu0 %v73_v6  ;;  %v106_v20 = vld [vmem:[#allocation7] sm:$0xff]  ;;  %v171_v21 = vld [vmem:[%s321_s2] ss:$0 sm:$0xff] }
  0x15   :  { %165 = vmatmul.msk.f32.vlgmr.msra.gmra.mxu0 %vm81_vm0, %v72_v7  ;;  %129 = vmatpush.msra.mxu1 %v118_v8  ;;  %v172_v25 = vld [vmem:[%s323_s4] ss:$0 sm:$0xff] }
  0x16   :  { %v173_v28 = vld [vmem:[%s324_s5] ss:$0 sm:$0xff] }
  0x17   :  { %130 = vmatpush.msra.mxu1 %v117_v9 }
  0x19   :  { %131 = vmatpush.msra.mxu1 %v116_v10 }
  0x1b   :  { %132 = vmatpush.msra.mxu1 %v115_v11 }
  0x1d   :  { %133 = vmatpush.msra.mxu1 %v114_v12 }
  0x1f   :  { %134 = vmatpush.msra.mxu1 %v113_v13 }
  0x21   :  { %135 = vmatpush.msra.mxu1 %v112_v14 }
  0x23   :  { %136 = vmatpush.msra.mxu1 %v111_v15 }
  0x25   :  { %137 = vmatpush.msra.mxu1 %v110_v16 }
  0x27   :  { %138 = vmatpush.msra.mxu1 %v109_v17 }
  0x29   :  { %139 = vmatpush.msra.mxu1 %v108_v18 }
  0x2b   :  { %140 = vmatpush.msra.mxu1 %v107_v19 }
  0x2d   :  { %141 = vmatpush.msra.mxu1 %v106_v20 }
  0x92   :  { %v102_v22 = vpop.f32.mrf.mxu0 }
  0x93   :  { %v103_v23 = vadd.f32 %v171_v21, %v102_v22 }
  0x95   :  { %v105_v24 = vmax.f32 %v103_v23, 0.0 }
  0x97   :  { %142 = vmatmul.f32.vlgmr.msra.gmra.mxu1 %v105_v24 }
 0x114   :  { %v143_v26 = vpop.f32.mrf.mxu1 }
 0x115   :  { %v144_v27 = vadd.f32 %v172_v25, %v143_v26 }
 0x117   :  { %v146_v29 = vmax.f32 %v144_v27, 0.0 }
 0x119   :  { %v151_v30 = vmul.f32 %v173_v28, %v146_v29 }
 0x11b   :  { %152 = vadd.xlane.f32.xlu0 %v151_v30 }
 0x18e   :  { %v153_v32 = vpop.xlane.xlu0 %152 }
 0x18f   :  { %v156_v33 = vadd.f32 %v155_v31, %v153_v32 }
 0x191   :  { %158 = vst.msk [vmem:[%s326_s7] sm:$0xff] %vm157_vm1, %v156_v33 }
 0x192   :  { %163 = vsyncpa [#allocation4], 1 }
 0x193   :  { %164 = vsyncpa [#allocation6], 1 }

</bundles_post_ra>
